<compile_context>
chip_gen: v6e
topology: v6e:2x2x1
jax: 0.10.0
libtpu: 0.0.40
codegen_flags: <defaults>
</compile_context>

<pallas_src>
import functools

import jax
import jax.numpy as jnp
from jax.experimental import pallas as pl
from jax.experimental.pallas import tpu as pltpu


def _round_up(x, m):
    return ((x + m - 1) // m) * m


def _mf_kernel(ue_ref, me_ref, bias_ref, out_ref, *, group_size, num_groups):
    """One grid step.

    ue_ref / me_ref : (TB, W) f32 VMEM tiles, W = num_groups * group_size
                      (num_groups original batch rows packed per vreg row)
    bias_ref        : (TB, num_groups) f32 — pre-summed user+mission+global bias
    out_ref         : (TB, num_groups) f32
    """
    prod = ue_ref[...] * me_ref[...]                         # VPU, lane-dense

    # Segmented lane reduction: sum each contiguous group of `group_size` lanes.
    # Done as a matmul with a constant block-diagonal selector on the idle MXU.
    w = group_size * num_groups
    row = jax.lax.broadcasted_iota(jnp.int32, (w, num_groups), 0)
    col = jax.lax.broadcasted_iota(jnp.int32, (w, num_groups), 1)
    lo = col * group_size
    sel = jnp.logical_and(row >= lo, row < lo + group_size).astype(jnp.float32)

    dot = jax.lax.dot_general(
        prod, sel,
        dimension_numbers=(((1,), (0,)), ((), ())),
        precision=jax.lax.Precision.HIGHEST,
        preferred_element_type=jnp.float32,
    )                                                        # (TB, num_groups)

    out_ref[...] = dot + bias_ref[...]


@functools.partial(jax.jit, static_argnames=("block_rows",))
def mf_forward(params, user, mission, *, block_rows=512):
    """MF forward. user/mission: int32 index vectors of shape (B,). Returns (B,) f32."""
    user_embedding, mission_embedding, user_bias, mission_bias, bias = params
    B = user.shape[0]
    D = user_embedding.shape[1]

    # Pack R consecutive batch rows per 128-lane vreg row when D divides 128.
    R = 128 // D if (D < 128 and 128 % D == 0) else 1
    W = R * D

    # Geometry: everything expressed in packed rows (sublanes). Pad the *indices*
    # (cheap, ~B*4 bytes) so the packed row count tiles evenly; 0 is a valid index.
    rows = -(-B // R)                                  # packed rows needed
    tb = min(block_rows, _round_up(rows, 8))           # sublane tile, multiple of 8
    rows_pad = _round_up(rows, tb)
    B_pad = rows_pad * R

    if B_pad != B:
        pad = B_pad - B
        user = jnp.concatenate([user, jnp.zeros((pad,), user.dtype)])
        mission = jnp.concatenate([mission, jnp.zeros((pad,), mission.dtype)])

    # --- glue: embedding lookups (efficient XLA fused gathers); the reshapes
    # below are free row-major views of contiguous gather outputs. -------------
    ue = jnp.take(user_embedding, user, axis=0).reshape(rows_pad, W)
    me = jnp.take(mission_embedding, mission, axis=0).reshape(rows_pad, W)
    bias_all = (
        jnp.take(user_bias, user, axis=0)[:, 0]
        + jnp.take(mission_bias, mission, axis=0)[:, 0]
        + bias[0]
    ).reshape(rows_pad, R)

    grid = (rows_pad // tb,)
    kernel = functools.partial(_mf_kernel, group_size=D, num_groups=R)

    out = pl.pallas_call(
        kernel,
        out_shape=jax.ShapeDtypeStruct((rows_pad, R), jnp.float32),
        grid_spec=pltpu.PrefetchScalarGridSpec(
            num_scalar_prefetch=0,
            grid=grid,
            in_specs=[
                pl.BlockSpec((tb, W), lambda i: (i, 0)),   # packed user emb rows
                pl.BlockSpec((tb, W), lambda i: (i, 0)),   # packed mission emb rows
                pl.BlockSpec((tb, R), lambda i: (i, 0)),   # packed pre-summed bias
            ],
            out_specs=pl.BlockSpec((tb, R), lambda i: (i, 0)),
        ),
        compiler_params=pltpu.CompilerParams(
            dimension_semantics=("parallel",),             # megacore-shardable grid
        ),
    )(ue, me, bias_all)

    # Row-major flatten of (rows_pad, R) is exactly original batch order.
    return out.reshape(-1)[:B]


def init_mf_params(key, num_users, num_missions, embedding_dim):
    """Deterministic init matching nn.Embedding default (N(0,1)) and zero global bias."""
    k1, k2, k3, k4 = jax.random.split(key, 4)
    user_embedding = jax.random.normal(k1, (num_users, embedding_dim), jnp.float32)
    mission_embedding = jax.random.normal(k2, (num_missions, embedding_dim), jnp.float32)
    user_bias = jax.random.normal(k3, (num_users, 1), jnp.float32)
    mission_bias = jax.random.normal(k4, (num_missions, 1), jnp.float32)
    bias = jnp.zeros((1,), jnp.float32)
    return (user_embedding, mission_embedding, user_bias, mission_bias, bias)


def mf_reference(params, user, mission):
    user_embedding, mission_embedding, user_bias, mission_bias, bias = params
    ue = user_embedding[user]
    me = mission_embedding[mission]
    ub = user_bias[user][:, 0]
    mb = mission_bias[mission][:, 0]
    return (jnp.sum(ue * me, axis=1) + ub + mb + bias[0]).reshape(-1)


if __name__ == "__main__":
    num_users, num_missions, embedding_dim = 10, 12, 32
    batch = 10   # deliberately not a multiple of the tile -> exercises index padding

    key = jax.random.PRNGKey(0)
    kp, ku, km = jax.random.split(key, 3)

    params = init_mf_params(kp, num_users, num_missions, embedding_dim)
    user = jax.random.randint(ku, (batch,), 0, num_users, dtype=jnp.int32)
    mission = jax.random.randint(km, (batch,), 0, num_missions, dtype=jnp.int32)

    out = mf_forward(params, user, mission)
    out = jax.block_until_ready(out)

    ref = mf_reference(params, user, mission)
    assert out.shape == (batch,), out.shape
    assert jnp.allclose(out, ref, atol=1e-4, rtol=1e-4), (out, ref)

    print("KERNEL_OK")
</pallas_src>

<mosaic_0001>
module attributes {stable_mosaic.version = 11 : i64} {
  func.func @_mf_kernel(%arg0: i32, %arg1: memref<8x128xf32, #tpu.memory_space<vmem>>, %arg2: memref<8x128xf32, #tpu.memory_space<vmem>>, %arg3: memref<8x4xf32, #tpu.memory_space<vmem>>, %arg4: memref<8x4xf32, #tpu.memory_space<vmem>>) attributes {dimension_semantics = [#tpu.dimension_semantics<parallel>], iteration_bounds = array<i64: 1>, scalar_prefetch = 0 : i64, scratch_operands = 0 : i64, tpu.core_type = #tpu.core_type<tc>, window_params = [{transform_indices = @transform_0, window_bounds = array<i64: 8, 128>}, {transform_indices = @transform_1, window_bounds = array<i64: 8, 128>}, {transform_indices = @transform_2, window_bounds = array<i64: 8, 4>}, {transform_indices = @transform_3, window_bounds = array<i64: 8, 4>}]} {
    %c0 = arith.constant 0 : index
    %c0_0 = arith.constant 0 : index
    %0 = vector.load %arg1[%c0, %c0_0] : memref<8x128xf32, #tpu.memory_space<vmem>>, vector<8x128xf32>
    %c0_1 = arith.constant 0 : index
    %c0_2 = arith.constant 0 : index
    %1 = vector.load %arg2[%c0_1, %c0_2] : memref<8x128xf32, #tpu.memory_space<vmem>>, vector<8x128xf32>
    %2 = arith.mulf %0, %1 : vector<8x128xf32>
    %3 = tpu.iota {dimensions = array<i32: 0>} : vector<128x4xi32>
    %4 = tpu.iota {dimensions = array<i32: 1>} : vector<128x4xi32>
    %c32_i32 = arith.constant 32 : i32
    %5 = vector.broadcast %c32_i32 : i32 to vector<128x4xi32>
    %6 = arith.muli %4, %5 : vector<128x4xi32>
    %7 = arith.cmpi sge, %3, %6 : vector<128x4xi32>
    %c32_i32_3 = arith.constant 32 : i32
    %8 = vector.broadcast %c32_i32_3 : i32 to vector<128x4xi32>
    %9 = arith.addi %6, %8 : vector<128x4xi32>
    %10 = arith.cmpi slt, %3, %9 : vector<128x4xi32>
    %11 = arith.andi %7, %10 : vector<128x4xi1>
    %12 = arith.extui %11 : vector<128x4xi1> to vector<128x4xi32>
    %13 = arith.sitofp %12 : vector<128x4xi32> to vector<128x4xf32>
    %cst = arith.constant dense<0.000000e+00> : vector<8x4xf32>
    %14 = tpu.matmul %2, %13, %cst {dimension_numbers = #tpu.dot_dimension_numbers<[1], [0], [0], [1], [0, 0, 1, 1], [], []>, precision = #tpu.contract_precision<fp32>} : vector<8x128xf32>, vector<128x4xf32>, vector<8x4xf32> -> vector<8x4xf32>
    %c0_4 = arith.constant 0 : index
    %c0_5 = arith.constant 0 : index
    %15 = vector.load %arg3[%c0_4, %c0_5] : memref<8x4xf32, #tpu.memory_space<vmem>>, vector<8x4xf32>
    %16 = arith.addf %14, %15 : vector<8x4xf32>
    %c0_6 = arith.constant 0 : index
    %c0_7 = arith.constant 0 : index
    %17 = vector.load %arg4[%c0_6, %c0_7] : memref<8x4xf32, #tpu.memory_space<vmem>>, vector<8x4xf32>
    tpu.vector_store %arg4[%c0_6, %c0_7], %16 {strides = array<i32>} : memref<8x4xf32, #tpu.memory_space<vmem>>, vector<8x4xf32>,
    return
  }
  func.func @transform_0(%arg0: i32) -> (i32, i32) {
    %c0_i32 = arith.constant 0 : i32
    %c0_i32_0 = arith.constant 0 : i32
    return %arg0, %c0_i32 : i32, i32
  }
  func.func @transform_1(%arg0: i32) -> (i32, i32) {
    %c0_i32 = arith.constant 0 : i32
    %c0_i32_0 = arith.constant 0 : i32
    return %arg0, %c0_i32 : i32, i32
  }
  func.func @transform_2(%arg0: i32) -> (i32, i32) {
    %c0_i32 = arith.constant 0 : i32
    %c0_i32_0 = arith.constant 0 : i32
    return %arg0, %c0_i32 : i32, i32
  }
  func.func @transform_3(%arg0: i32) -> (i32, i32) {
    %c0_i32 = arith.constant 0 : i32
    %c0_i32_0 = arith.constant 0 : i32
    return %arg0, %c0_i32 : i32, i32
  }
}

</mosaic_0001>

<bundles_post_ra>
// kernel: mf_forward.1
= control target key start
LH: loop header
LB: loop body
LE: loop exit
PB: predicated region body
PF: predicated region fallthrough
CT: control target
= control target key end

     0   :  { %v17_v0 = vlaneseq  ;;  %v1145_v1 = vmov 0.0   ;;  %vm1805_vm0 = vmmov 0   ;;  %v1147_v18 = vmov 1.0   ;;  %s1801_s0 = inlined_call_operand.vmem [shape: f32[8,128], index: 0, kind: input, shape index: {}]   ;;  %s1802_s1 = inlined_call_operand.vmem [shape: f32[8,128], index: 1, kind: input, shape index: {}]   ;;  %s1803_s2 = inlined_call_operand.vmem [shape: f32[8,4], index: 2, kind: input, shape index: {}]   ;;  %s1804_s3 = inlined_call_operand.vmem [shape: f32[8,4], index: 3, kind: output, shape index: {}]  }
   0x1   :  { %932 = vmatprep.subr.mxu0 %v1145_v1  ;;  %967 = vmatprep.subr.mxu1 %v1145_v1  ;;  %v14_v2 = vld [vmem:[%s1801_s0] sm:$0xff]  ;;  %v1827_v46 = vmov 0  ;;  %v1829_v52 = vmov 0  ;;  %v1831_v57 = vmov 0 }
   0x2   :  { %v15_v3 = vld [vmem:[%s1802_s1] sm:$0xff]  ;;  %v1176_v4 = vshrl.u32 %v17_v0, 7  ;;  %v35_v5 = vand.u32 127, %v17_v0  ;;  %964 = vmatprep.mubr.msk.f32.mxu0 %vm1805_vm0, %v1145_v1  ;;  %999 = vmatprep.mubr.msk.f32.mxu1 %vm1805_vm0, %v1145_v1 }
   0x3   :  { %v1182_v6 = vmul.f32 %v15_v3, %v14_v2 }
   0x4   :  { %v33_v7 = vadd.s32 120, %v1176_v4  ;;  %v1185_v8 = vmul.u32 32, %v35_v5  ;;  %v32_v9 = vadd.s32 112, %v1176_v4  ;;  %v31_v10 = vadd.s32 104, %v1176_v4 }
   0x5   :  { %v30_v11 = vadd.s32 96, %v1176_v4  ;;  %v29_v12 = vadd.s32 88, %v1176_v4  ;;  %v28_v13 = vadd.s32 80, %v1176_v4  ;;  %v27_v14 = vadd.s32 72, %v1176_v4 }
   0x6   :  { %vm52_vm1 = vcmp.ge.s32.totalorder %v33_v7, %v1185_v8  ;;  %v1195_v15 = vadd.s32 32, %v1185_v8  ;;  %vm51_vm2 = vcmp.ge.s32.totalorder %v32_v9, %v1185_v8  ;;  %vm50_vm3 = vcmp.ge.s32.totalorder %v31_v10, %v1185_v8 }
   0x7   :  { %vm49_vm4 = vcmp.ge.s32.totalorder %v30_v11, %v1185_v8  ;;  %vm48_vm5 = vcmp.ge.s32.totalorder %v29_v12, %v1185_v8  ;;  %vm47_vm6 = vcmp.ge.s32.totalorder %v28_v13, %v1185_v8  ;;  %vm46_vm7 = vcmp.ge.s32.totalorder %v27_v14, %v1185_v8 }
   0x8   :  { %vm69_vm8 = vcmp.lt.s32.totalorder %v33_v7, %v1195_v15  ;;  %vm68_vm9 = vcmp.lt.s32.totalorder %v32_v9, %v1195_v15  ;;  %vm67_vm10 = vcmp.lt.s32.totalorder %v31_v10, %v1195_v15  ;;  %vm66_vm11 = vcmp.lt.s32.totalorder %v30_v11, %v1195_v15 }
   0x9   :  { %vm1207_vm12 = vmand %vm52_vm1, %vm69_vm8  ;;  %vm65_vm13 = vcmp.lt.s32.totalorder %v29_v12, %v1195_v15  ;;  %vm64_vm14 = vcmp.lt.s32.totalorder %v28_v13, %v1195_v15  ;;  %vm63_vm15 = vcmp.lt.s32.totalorder %v27_v14, %v1195_v15  ;;  %v26_v17 = vadd.s32 64, %v1176_v4 }
   0xa   :  { %933 = vmatpush3.msk.msra.mxu0 %vm1207_vm12, %v1147_v18  ;;  %vm1220_vm0 = vmand %vm51_vm2, %vm68_vm9  ;;  %v781_v20 = vsel %vm1207_vm12, 1.0, %v1145_v1  ;;  %v25_v21 = vadd.s32 56, %v1176_v4  ;;  %v24_v22 = vadd.s32 48, %v1176_v4  ;;  %v1230_v23 = vadd.s32 40, %v1176_v4 }
   0xb   :  { %934 = vmatprep.subr.mxu0 %v1145_v1  ;;  %v780_v24 = vsel %vm1220_vm0, 1.0, %v1145_v1  ;;  %vm1240_vm1 = vmand %vm50_vm3, %vm67_vm10  ;;  %v1244_v26 = vsub.f32 %v781_v20, %v781_v20  ;;  %vm45_vm2 = vcmp.ge.s32.totalorder %v26_v17, %v1185_v8  ;;  %vm62_vm8 = vcmp.lt.s32.totalorder %v26_v17, %v1195_v15 }
   0xc   :  { %935 = vmatpush3.msk.msra.mxu0 %vm1220_vm0, %v1147_v18  ;;  %v1251_v27 = vsub.f32 %v780_v24, %v780_v24  ;;  %v779_v28 = vsel %vm1240_vm1, 1.0, %v1145_v1  ;;  %vm1260_vm3 = vmand %vm49_vm4, %vm66_vm11  ;;  %vm44_vm9 = vcmp.ge.s32.totalorder %v25_v21, %v1185_v8  ;;  %vm61_vm10 = vcmp.lt.s32.totalorder %v25_v21, %v1195_v15 }
   0xd   :  { %936 = vmatprep.subr.mxu0 %v1145_v1  ;;  %v1267_v30 = vsub.f32 %v779_v28, %v779_v28  ;;  %v778_v31 = vsel %vm1260_vm3, 1.0, %v1145_v1  ;;  %vm1276_vm4 = vmand %vm48_vm5, %vm65_vm13  ;;  %v213_v33 = vand.u32 4294901760, %v1244_v26  ;;  %vm43_vm11 = vcmp.ge.s32.totalorder %v24_v22, %v1185_v8 }
   0xe   :  { %937 = vmatpush3.msk.msra.mxu0 %vm1240_vm1, %v1147_v18  ;;  %v1285_v34 = vsub.f32 %v778_v31, %v778_v31  ;;  %v777_v35 = vsel %vm1276_vm4, 1.0, %v1145_v1  ;;  %vm1294_vm5 = vmand %vm47_vm6, %vm64_vm14  ;;  %v220_v37 = vand.u32 4294901760, %v1251_v27  ;;  %vm60_vm13 = vcmp.lt.s32.totalorder %v24_v22, %v1195_v15 }
   0xf   :  { %938 = vmatprep.subr.mxu0 %v1145_v1  ;;  %v1301_v38 = vsub.f32 %v777_v35, %v777_v35  ;;  %v214_v39 = vsub.f32 %v1244_v26, %v213_v33  ;;  %v776_v40 = vsel %vm1294_vm5, 1.0, %v1145_v1  ;;  %vm1313_vm6 = vmand %vm46_vm7, %vm63_vm15  ;;  %v227_v42 = vand.u32 4294901760, %v1267_v30 }
  0x10   :  { %939 = vmatpush3.msk.msra.mxu0 %vm1260_vm3, %v1147_v18  ;;  %v1321_v43 = vsub.f32 %v776_v40, %v776_v40  ;;  %v221_v44 = vsub.f32 %v1251_v27, %v220_v37  ;;  %v775_v45 = vsel %vm1313_vm6, 1.0, %v1145_v1  ;;  %vm1333_vm7 = vmand %vm45_vm2, %vm62_vm8  ;;  %v234_v47 = vand.u32 4294901760, %v1285_v34 }
  0x11   :  { %v1828_v46 = vsel %vm1333_vm7, 4294967295, %v1827_v46  ;;  %940 = vmatprep.subr.mxu0 %v1145_v1  ;;  %v215_v48 = vand.u32 4294901760, %v214_v39  ;;  %v1339_v49 = vsub.f32 %v775_v45, %v775_v45  ;;  %v228_v50 = vsub.f32 %v1267_v30, %v227_v42  ;;  %vm1351_vm14 = vmand %vm44_vm9, %vm61_vm10 }
  0x12   :  { %v774_v51 = vsel %vm1333_vm7, 1.0, %v1145_v1  ;;  %v1830_v52 = vsel %vm1351_vm14, 4294967295, %v1829_v52  ;;  %941 = vmatpush3.msk.msra.mxu0 %vm1276_vm4, %v1147_v18  ;;  %v222_v53 = vand.u32 4294901760, %v221_v44  ;;  %v235_v55 = vsub.f32 %v1285_v34, %v234_v47  ;;  %vm1370_vm15 = vmand %vm43_vm11, %vm60_vm13 }
  0x13   :  { %v1358_v54 = vsub.f32 %v774_v51, %v774_v51  ;;  %v773_v56 = vsel %vm1351_vm14, 1.0, %v1145_v1  ;;  %v1832_v57 = vsel %vm1370_vm15, 4294967295, %v1831_v57  ;;  %942 = vmatprep.subr.mxu0 %v1145_v1  ;;  %968 = vmatpush3.msra.mxu1 %v215_v48  ;;  %v229_v58 = vand.u32 4294901760, %v228_v50 }
  0x14   :  { %v1375_v59 = vsub.f32 %v773_v56, %v773_v56  ;;  %v241_v60 = vand.u32 4294901760, %v1301_v38  ;;  %v772_v61 = vsel %vm1370_vm15, 1.0, %v1145_v1  ;;  %943 = vmatpush3.msk.msra.mxu0 %vm1294_vm5, %v1147_v18  ;;  %969 = vmatprep.subr.mxu1 %v1145_v1  ;;  %v236_v62 = vand.u32 4294901760, %v235_v55 }
  0x15   :  { %v1385_v63 = vsub.f32 %v772_v61, %v772_v61  ;;  %v248_v0 = vand.u32 4294901760, %v1321_v43  ;;  %vm42_vm2 = vcmp.ge.s32.totalorder %v1230_v23, %v1185_v8  ;;  %944 = vmatprep.subr.mxu0 %v1145_v1  ;;  %970 = vmatpush3.msra.mxu1 %v222_v53  ;;  %vm59_vm8 = vcmp.lt.s32.totalorder %v1230_v23, %v1195_v15 }
  0x16   :  { %v242_v2 = vsub.f32 %v1301_v38, %v241_v60  ;;  %v255_v3 = vand.u32 4294901760, %v1339_v49  ;;  %v22_v5 = vadd.s32 32, %v1176_v4  ;;  %945 = vmatpush3.msk.msra.mxu0 %vm1313_vm6, %v1147_v18  ;;  %971 = vmatprep.subr.mxu1 %v1145_v1  ;;  %vm1405_vm9 = vmand %vm42_vm2, %vm59_vm8  ;;  %v262_v10 = vand.u32 4294901760, %v1358_v54 }
  0x17   :  { %v249_v7 = vsub.f32 %v1321_v43, %v248_v0  ;;  %v21_v11 = vadd.s32 24, %v1176_v4  ;;  %v269_v12 = vand.u32 4294901760, %v1375_v59  ;;  %946 = vmatprep.subr.mxu0 %v1145_v1  ;;  %972 = vmatpush3.msra.mxu1 %v229_v58  ;;  %v771_v14 = vsel %vm1405_vm9, 1.0, %v1145_v1 }
  0x18   :  { %v243_v13 = vand.u32 4294901760, %v242_v2  ;;  %v256_v17 = vsub.f32 %v1339_v49, %v255_v3  ;;  %vm41_vm10 = vcmp.ge.s32.totalorder %v22_v5, %v1185_v8  ;;  %947 = vmatpush3.msk.msra.mxu0 %vm1333_vm7, %v1147_v18  ;;  %973 = vmatprep.subr.mxu1 %v1145_v1  ;;  %v1424_v20 = vsub.f32 %v771_v14, %v771_v14 }
  0x19   :  { %vm58_vm11 = vcmp.lt.s32.totalorder %v22_v5, %v1195_v15  ;;  %v263_v21 = vsub.f32 %v1358_v54, %v262_v10  ;;  %948 = vmatprep.subr.mxu0 %v1145_v1  ;;  %974 = vmatpush3.msra.mxu1 %v236_v62  ;;  %v250_v22 = vand.u32 4294901760, %v249_v7  ;;  %vm40_vm2 = vcmp.ge.s32.totalorder %v21_v11, %v1185_v8 }
  0x1a   :  { %v257_v23 = vand.u32 4294901760, %v256_v17  ;;  %vm1431_vm13 = vmand %vm41_vm10, %vm58_vm11  ;;  %vm57_vm8 = vcmp.lt.s32.totalorder %v21_v11, %v1195_v15  ;;  %949 = vmatpush3.msk.msra.mxu0 %vm1351_vm14, %v1147_v18  ;;  %975 = vmatprep.subr.mxu1 %v1145_v1  ;;  %v270_v35 = vsub.f32 %v1375_v59, %v269_v12  ;;  %v20_v39 = vadd.s32 16, %v1176_v4 }
  0x1b   :  { %v770_v28 = vsel %vm1431_vm13, 1.0, %v1145_v1  ;;  %vm1444_vm7 = vmand %vm40_vm2, %vm57_vm8  ;;  %v276_v40 = vand.u32 4294901760, %v1385_v63  ;;  %950 = vmatprep.subr.mxu0 %v1145_v1  ;;  %976 = vmatpush3.msra.mxu1 %v243_v13  ;;  %v264_v45 = vand.u32 4294901760, %v263_v21  ;;  %v19_v50 = vadd.s32 8, %v1176_v4 }
  0x1c   :  { %v1454_v44 = vsub.f32 %v770_v28, %v770_v28  ;;  %v769_v48 = vsel %vm1444_vm7, 1.0, %v1145_v1  ;;  %951 = vmatpush3.msk.msra.mxu0 %vm1370_vm15, %v1147_v18  ;;  %977 = vmatprep.subr.mxu1 %v1145_v1  ;;  %vm39_vm10 = vcmp.ge.s32.totalorder %v20_v39, %v1185_v8  ;;  %vm56_vm11 = vcmp.lt.s32.totalorder %v20_v39, %v1195_v15 }
  0x1d   :  { %v1464_v51 = vsub.f32 %v769_v48, %v769_v48  ;;  %v283_v53 = vand.u32 4294901760, %v1424_v20  ;;  %952 = vmatprep.subr.mxu0 %v1145_v1  ;;  %978 = vmatpush3.msra.mxu1 %v250_v22  ;;  %vm1470_vm2 = vmand %vm39_vm10, %vm56_vm11  ;;  %v277_v56 = vsub.f32 %v1385_v63, %v276_v40  ;;  %vm38_vm8 = vcmp.ge.s32.totalorder %v19_v50, %v1185_v8 }
  0x1e   :  { %vm55_vm15 = vcmp.lt.s32.totalorder %v19_v50, %v1195_v15  ;;  %v290_v58 = vand.u32 4294901760, %v1454_v44  ;;  %953 = vmatpush3.msk.msra.mxu0 %vm1405_vm9, %v1147_v18  ;;  %979 = vmatprep.subr.mxu1 %v1145_v1  ;;  %v768_v61 = vsel %vm1470_vm2, 1.0, %v1145_v1  ;;  %vm37_vm11 = vcmp.ge.s32.totalorder %v1176_v4, %v1185_v8 }
  0x1f   :  { %vm1487_vm10 = vmand %vm38_vm8, %vm55_vm15  ;;  %vm54_vm14 = vcmp.lt.s32.totalorder %v1176_v4, %v1195_v15  ;;  %954 = vmatprep.subr.mxu0 %v1145_v1  ;;  %980 = vmatpush3.msra.mxu1 %v257_v23  ;;  %v271_v2 = vand.u32 4294901760, %v270_v35  ;;  %v1496_v5 = vsub.f32 %v768_v61, %v768_v61  ;;  %v284_v11 = vsub.f32 %v1424_v20, %v283_v53 }
  0x20   :  { %v767_v7 = vsel %vm1487_vm10, 1.0, %v1145_v1  ;;  %vm1504_vm15 = vmand %vm37_vm11, %vm54_vm14  ;;  %955 = vmatpush3.msk.msra.mxu0 %vm1431_vm13, %v1147_v18  ;;  %981 = vmatprep.subr.mxu1 %v1145_v1  ;;  %v278_v4 = vand.u32 4294901760, %v277_v56  ;;  %v1518_v14 = vand.u32 4294901760, %v1182_v6  ;;  %v291_v21 = vsub.f32 %v1454_v44, %v290_v58 }
  0x21   :  { %v1512_v8 = vsub.f32 %v767_v7, %v767_v7  ;;  %v766_v15 = vsel %vm1504_vm15, 1.0, %v1145_v1  ;;  %956 = vmatprep.subr.mxu0 %v1145_v1  ;;  %982 = vmatpush3.msra.mxu1 %v264_v45  ;;  %v297_v22 = vand.u32 4294901760, %v1464_v51  ;;  %v304_v23 = vand.u32 4294901760, %v1496_v5 }
  0x22   :  { %v1521_v17 = vsub.f32 %v766_v15, %v766_v15  ;;  %957 = vmatpush3.msk.msra.mxu0 %vm1444_vm7, %v1147_v18  ;;  %983 = vmatprep.subr.mxu1 %v1145_v1  ;;  %v1534_v28 = vsub.f32 %v1182_v6, %v1518_v14  ;;  %v285_v35 = vand.u32 4294901760, %v284_v11  ;;  %v292_v6 = vand.u32 4294901760, %v291_v21 }
  0x23   :  { %958 = vmatprep.subr.mxu0 %v1145_v1  ;;  %984 = vmatpush3.msra.mxu1 %v271_v2  ;;  %v298_v39 = vsub.f32 %v1464_v51, %v297_v22  ;;  %v311_v45 = vand.u32 4294901760, %v1512_v8  ;;  %v305_v50 = vsub.f32 %v1496_v5, %v304_v23  ;;  %vm1845_vm14 = vnez %v1828_v46 }
  0x24   :  { %959 = vmatpush3.msk.msra.mxu0 %vm1470_vm2, %v1147_v18  ;;  %985 = vmatprep.subr.mxu1 %v1145_v1  ;;  %v202_v48 = vand.u32 4294901760, %v1534_v28  ;;  %v318_v56 = vand.u32 4294901760, %v1521_v17  ;;  %vm1846_vm8 = vnez %v1830_v52  ;;  %vm1847_vm11 = vnez %v1832_v57 }
  0x25   :  { %960 = vmatprep.subr.mxu0 %v1145_v1  ;;  %986 = vmatpush3.msra.mxu1 %v278_v4  ;;  %v299_v2 = vand.u32 4294901760, %v298_v39  ;;  %v312_v7 = vsub.f32 %v1512_v8, %v311_v45  ;;  %v306_v4 = vand.u32 4294901760, %v305_v50 }
  0x26   :  { %961 = vmatpush3.msk.msra.mxu0 %vm1487_vm10, %v1147_v18  ;;  %987 = vmatprep.subr.mxu1 %v1145_v1  ;;  %v203_v61 = vsub.f32 %v1534_v28, %v202_v48  ;;  %v319_v15 = vsub.f32 %v1521_v17, %v318_v56 }
  0x27   :  { %962 = vmatprep.subr.mxu0 %v1145_v1  ;;  %988 = vmatpush3.msra.mxu1 %v285_v35  ;;  %v313_v21 = vand.u32 4294901760, %v312_v7 }
  0x28   :  { %963 = vmatpush3.msk.msra.mxu0 %vm1504_vm15, %v1147_v18  ;;  %989 = vmatprep.subr.mxu1 %v1145_v1  ;;  %v204_v11 = vand.u32 4294901760, %v203_v61  ;;  %v320_v35 = vand.u32 4294901760, %v319_v15 }
  0x29   :  { %990 = vmatpush3.msra.mxu1 %v292_v6  ;;  %1002 = vmatprep.subr.mxu0 %v1145_v1 }
  0x2a   :  { %965 = vmatmul.mubr.f32.vlgmr.msra.gmra.mxu0 %v204_v11  ;;  %991 = vmatprep.subr.mxu1 %v1145_v1 }
  0x2b   :  { %1003 = vmatpush3.msra.mxu0 %v1244_v26  ;;  %992 = vmatpush3.msra.mxu1 %v299_v2 }
  0x2c   :  { %1004 = vmatprep.subr.mxu0 %v1145_v1  ;;  %993 = vmatprep.subr.mxu1 %v1145_v1 }
  0x2d   :  { %1005 = vmatpush3.msra.mxu0 %v1251_v27  ;;  %994 = vmatpush3.msra.mxu1 %v306_v4 }
  0x2e   :  { %1006 = vmatprep.subr.mxu0 %v1145_v1  ;;  %995 = vmatprep.subr.mxu1 %v1145_v1 }
  0x2f   :  { %1007 = vmatpush3.msra.mxu0 %v1267_v30  ;;  %996 = vmatpush3.msra.mxu1 %v313_v21 }
  0x30   :  { %1008 = vmatprep.subr.mxu0 %v1145_v1  ;;  %997 = vmatprep.subr.mxu1 %v1145_v1 }
  0x31   :  { %1009 = vmatpush3.msra.mxu0 %v1285_v34  ;;  %998 = vmatpush3.msra.mxu1 %v320_v35 }
  0x32   :  { %1010 = vmatprep.subr.mxu0 %v1145_v1  ;;  %1000 = vmatmul.mubr.f32.vlgmr.msra.gmra.mxu1 %v1518_v14 }
  0x33   :  { %1011 = vmatpush3.msra.mxu0 %v1301_v38  ;;  %1037 = vmatprep.subr.mxu1 %v1145_v1 }
  0x34   :  { %1012 = vmatprep.subr.mxu0 %v1145_v1  ;;  %1038 = vmatpush3.msk.msra.mxu1 %vm1207_vm12, %v1147_v18 }
  0x35   :  { %1013 = vmatpush3.msra.mxu0 %v1321_v43  ;;  %1039 = vmatprep.subr.mxu1 %v1145_v1 }
  0x36   :  { %1014 = vmatprep.subr.mxu0 %v1145_v1  ;;  %1040 = vmatpush3.msk.msra.mxu1 %vm1220_vm0, %v1147_v18 }
  0x37   :  { %1015 = vmatpush3.msra.mxu0 %v1339_v49  ;;  %1041 = vmatprep.subr.mxu1 %v1145_v1 }
  0x38   :  { %1016 = vmatprep.subr.mxu0 %v1145_v1  ;;  %1042 = vmatpush3.msk.msra.mxu1 %vm1240_vm1, %v1147_v18 }
  0x39   :  { %1017 = vmatpush3.msra.mxu0 %v1358_v54  ;;  %1043 = vmatprep.subr.mxu1 %v1145_v1 }
  0x3a   :  { %1018 = vmatprep.subr.mxu0 %v1145_v1  ;;  %1044 = vmatpush3.msk.msra.mxu1 %vm1260_vm3, %v1147_v18 }
  0x3b   :  { %1019 = vmatpush3.msra.mxu0 %v1375_v59  ;;  %1045 = vmatprep.subr.mxu1 %v1145_v1 }
  0x3c   :  { %1020 = vmatprep.subr.mxu0 %v1145_v1  ;;  %1046 = vmatpush3.msk.msra.mxu1 %vm1276_vm4, %v1147_v18 }
  0x3d   :  { %1021 = vmatpush3.msra.mxu0 %v1385_v63  ;;  %1047 = vmatprep.subr.mxu1 %v1145_v1 }
  0x3e   :  { %1022 = vmatprep.subr.mxu0 %v1145_v1  ;;  %1048 = vmatpush3.msk.msra.mxu1 %vm1294_vm5, %v1147_v18 }
  0x3f   :  { %1023 = vmatpush3.msra.mxu0 %v1424_v20  ;;  %1049 = vmatprep.subr.mxu1 %v1145_v1 }
  0x40   :  { %1024 = vmatprep.subr.mxu0 %v1145_v1  ;;  %1050 = vmatpush3.msk.msra.mxu1 %vm1313_vm6, %v1147_v18 }
  0x41   :  { %1025 = vmatpush3.msra.mxu0 %v1454_v44  ;;  %1051 = vmatprep.subr.mxu1 %v1145_v1 }
  0x42   :  { %1026 = vmatprep.subr.mxu0 %v1145_v1  ;;  %1052 = vmatpush3.msk.msra.mxu1 %vm1845_vm14, %v1147_v18 }
  0x43   :  { %1027 = vmatpush3.msra.mxu0 %v1464_v51  ;;  %1053 = vmatprep.subr.mxu1 %v1145_v1 }
  0x44   :  { %1028 = vmatprep.subr.mxu0 %v1145_v1  ;;  %1054 = vmatpush3.msk.msra.mxu1 %vm1846_vm8, %v1147_v18  ;;  %vm1848_vm8 = vmmov 0  }
  0x45   :  { %1029 = vmatpush3.msra.mxu0 %v1496_v5  ;;  %1055 = vmatprep.subr.mxu1 %v1145_v1 }
  0x46   :  { %1030 = vmatprep.subr.mxu0 %v1145_v1  ;;  %1056 = vmatpush3.msk.msra.mxu1 %vm1847_vm11, %v1147_v18 }
  0x47   :  { %1031 = vmatpush3.msra.mxu0 %v1512_v8  ;;  %1057 = vmatprep.subr.mxu1 %v1145_v1 }
  0x48   :  { %1032 = vmatprep.subr.mxu0 %v1145_v1  ;;  %1058 = vmatpush3.msk.msra.mxu1 %vm1405_vm9, %v1147_v18 }
  0x49   :  { %1033 = vmatpush3.msra.mxu0 %v1521_v17  ;;  %1034 = vmatprep.mubr.msk.f32.mxu0 %vm1848_vm8, %v1145_v1 }
  0x4a   :  { %1059 = vmatprep.subr.mxu1 %v1145_v1  ;;  %1035 = vmatmul.mubr.f32.vlgmr.msra.gmra.mxu0 %v1534_v28 }
  0x4b   :  { %1060 = vmatpush3.msk.msra.mxu1 %vm1431_vm13, %v1147_v18  ;;  %1072 = vmatprep.subr.mxu0 %v1145_v1 }
  0x4c   :  { %1061 = vmatprep.subr.mxu1 %v1145_v1  ;;  %1073 = vmatpush3.msra.mxu0 %v213_v33  ;;  %v118_v33 = vld [vmem:[%s1803_s2] sm:$0xff] }
  0x4d   :  { %1062 = vmatpush3.msk.msra.mxu1 %vm1444_vm7, %v1147_v18  ;;  %1074 = vmatprep.subr.mxu0 %v1145_v1 }
  0x4e   :  { %1063 = vmatprep.subr.mxu1 %v1145_v1  ;;  %1075 = vmatpush3.msra.mxu0 %v220_v37 }
  0x4f   :  { %1064 = vmatpush3.msk.msra.mxu1 %vm1470_vm2, %v1147_v18  ;;  %1076 = vmatprep.subr.mxu0 %v1145_v1 }
  0x50   :  { %1065 = vmatprep.subr.mxu1 %v1145_v1  ;;  %1077 = vmatpush3.msra.mxu0 %v227_v42 }
  0x51   :  { %1066 = vmatpush3.msk.msra.mxu1 %vm1487_vm10, %v1147_v18  ;;  %1078 = vmatprep.subr.mxu0 %v1145_v1 }
  0x52   :  { %1067 = vmatprep.subr.mxu1 %v1145_v1  ;;  %1079 = vmatpush3.msra.mxu0 %v234_v47 }
  0x53   :  { %1068 = vmatpush3.msk.msra.mxu1 %vm1504_vm15, %v1147_v18  ;;  %1069 = vmatprep.mubr.msk.f32.mxu1 %vm1848_vm8, %v1145_v1 }
  0x54   :  { %1080 = vmatprep.subr.mxu0 %v1145_v1  ;;  %1070 = vmatmul.mubr.f32.vlgmr.msra.gmra.mxu1 %v202_v48 }
  0x55   :  { %1081 = vmatpush3.msra.mxu0 %v241_v60  ;;  %1107 = vmatprep.subr.mxu1 %v1145_v1 }
  0x56   :  { %1082 = vmatprep.subr.mxu0 %v1145_v1  ;;  %1108 = vmatpush3.msk.msra.mxu1 %vm1207_vm12, %v1147_v18  ;;  %vm760_vm12 = vcmask 31744  }
  0x57   :  { %1083 = vmatpush3.msra.mxu0 %v248_v0  ;;  %1109 = vmatprep.subr.mxu1 %v1145_v1 }
  0x58   :  { %1084 = vmatprep.subr.mxu0 %v1145_v1  ;;  %1110 = vmatpush3.msk.msra.mxu1 %vm1220_vm0, %v1147_v18  ;;  %vm1849_vm0 = vnez %v1830_v52 }
  0x59   :  { %1085 = vmatpush3.msra.mxu0 %v255_v3  ;;  %1111 = vmatprep.subr.mxu1 %v1145_v1 }
  0x5a   :  { %1086 = vmatprep.subr.mxu0 %v1145_v1  ;;  %1112 = vmatpush3.msk.msra.mxu1 %vm1240_vm1, %v1147_v18 }
  0x5b   :  { %1087 = vmatpush3.msra.mxu0 %v262_v10  ;;  %1113 = vmatprep.subr.mxu1 %v1145_v1 }
  0x5c   :  { %1088 = vmatprep.subr.mxu0 %v1145_v1  ;;  %1114 = vmatpush3.msk.msra.mxu1 %vm1260_vm3, %v1147_v18 }
  0x5d   :  { %1089 = vmatpush3.msra.mxu0 %v269_v12  ;;  %1115 = vmatprep.subr.mxu1 %v1145_v1 }
  0x5e   :  { %1090 = vmatprep.subr.mxu0 %v1145_v1  ;;  %1116 = vmatpush3.msk.msra.mxu1 %vm1276_vm4, %v1147_v18 }
  0x5f   :  { %1091 = vmatpush3.msra.mxu0 %v276_v40  ;;  %1117 = vmatprep.subr.mxu1 %v1145_v1 }
  0x60   :  { %1092 = vmatprep.subr.mxu0 %v1145_v1  ;;  %1118 = vmatpush3.msk.msra.mxu1 %vm1294_vm5, %v1147_v18 }
  0x61   :  { %1093 = vmatpush3.msra.mxu0 %v283_v53  ;;  %1119 = vmatprep.subr.mxu1 %v1145_v1 }
  0x62   :  { %1094 = vmatprep.subr.mxu0 %v1145_v1  ;;  %1120 = vmatpush3.msk.msra.mxu1 %vm1313_vm6, %v1147_v18 }
  0x63   :  { %1095 = vmatpush3.msra.mxu0 %v290_v58  ;;  %1121 = vmatprep.subr.mxu1 %v1145_v1 }
  0x64   :  { %1096 = vmatprep.subr.mxu0 %v1145_v1  ;;  %1122 = vmatpush3.msk.msra.mxu1 %vm1845_vm14, %v1147_v18 }
  0x65   :  { %1097 = vmatpush3.msra.mxu0 %v297_v22  ;;  %1123 = vmatprep.subr.mxu1 %v1145_v1 }
  0x66   :  { %1098 = vmatprep.subr.mxu0 %v1145_v1  ;;  %1124 = vmatpush3.msk.msra.mxu1 %vm1849_vm0, %v1147_v18 }
  0x67   :  { %1099 = vmatpush3.msra.mxu0 %v304_v23  ;;  %1125 = vmatprep.subr.mxu1 %v1145_v1 }
  0x68   :  { %1100 = vmatprep.subr.mxu0 %v1145_v1  ;;  %1126 = vmatpush3.msk.msra.mxu1 %vm1847_vm11, %v1147_v18 }
  0x69   :  { %1101 = vmatpush3.msra.mxu0 %v311_v45  ;;  %1127 = vmatprep.subr.mxu1 %v1145_v1 }
  0x6a   :  { %1102 = vmatprep.subr.mxu0 %v1145_v1  ;;  %1128 = vmatpush3.msk.msra.mxu1 %vm1405_vm9, %v1147_v18 }
  0x6b   :  { %1103 = vmatpush3.msra.mxu0 %v318_v56  ;;  %1104 = vmatprep.mubr.msk.f32.mxu0 %vm1848_vm8, %v1145_v1 }
  0x6c   :  { %1129 = vmatprep.subr.mxu1 %v1145_v1  ;;  %1105 = vmatmul.mubr.f32.vlgmr.msra.gmra.mxu0 %v1518_v14 }
  0x6d   :  { %1130 = vmatpush3.msk.msra.mxu1 %vm1431_vm13, %v1147_v18  ;;  %1139 = vmatprep.mubr.msk.f32.mxu1 %vm1848_vm8, %v1145_v1 }
  0x6e   :  { %1131 = vmatprep.subr.mxu1 %v1145_v1 }
  0x6f   :  { %1132 = vmatpush3.msk.msra.mxu1 %vm1444_vm7, %v1147_v18 }
  0x70   :  { %1133 = vmatprep.subr.mxu1 %v1145_v1 }
  0x71   :  { %1134 = vmatpush3.msk.msra.mxu1 %vm1470_vm2, %v1147_v18 }
  0x72   :  { %1135 = vmatprep.subr.mxu1 %v1145_v1 }
  0x73   :  { %1136 = vmatpush3.msk.msra.mxu1 %vm1487_vm10, %v1147_v18 }
  0x74   :  { %1137 = vmatprep.subr.mxu1 %v1145_v1 }
  0x75   :  { %1138 = vmatpush3.msk.msra.mxu1 %vm1504_vm15, %v1147_v18 }
  0x76   :  { %1140 = vmatmul.mubr.f32.vlgmr.msra.gmra.mxu1 %v1518_v14 }
  0xea   :  { %v206_v16 = vpop.f32.mrf.mxu0 }
  0xeb   :  { %v207_v34 = vadd.f32 %v206_v16, %v118_v33 }
  0xec   :  { %v966_v19 = vpop.f32.mrf.mxu0 }
  0xf2   :  { %v357_v25 = vpop.f32.mrf.mxu1 }
  0xf3   :  { %v358_v37 = vadd.f32 %v357_v25, %v207_v34 }
  0xf4   :  { %v1001_v26 = vpop.f32.mrf.mxu1 }
 0x10a   :  { %v461_v27 = vpop.f32.mrf.mxu0 }
 0x10b   :  { %v462_v38 = vadd.f32 %v461_v27, %v358_v37 }
 0x10c   :  { %v1036_v29 = vpop.f32.mrf.mxu0 }
 0x114   :  { %v550_v30 = vpop.f32.mrf.mxu1 }
 0x115   :  { %v551_v18 = vadd.f32 %v550_v30, %v462_v38 }
 0x116   :  { %v1071_v32 = vpop.f32.mrf.mxu1 }
 0x12c   :  { %v669_v1 = vpop.f32.mrf.mxu0 }
 0x12d   :  { %v670_v41 = vadd.f32 %v669_v1, %v551_v18 }
 0x12e   :  { %v1106_v36 = vpop.f32.mrf.mxu0 }
 0x136   :  { %v756_v42 = vpop.f32.mrf.mxu1 }
 0x137   :  { %v757_v43 = vadd.f32 %v756_v42, %v670_v41 }
 0x138   :  { %v1141_v46 = vpop.f32.mrf.mxu1 }
 0x139   :  { %761 = vst.msk [vmem:[%s1804_s3] sm:$0xff] %vm760_vm12, %v757_v43 }

</bundles_post_ra>
